<compile_context>
chip_gen: v7x
topology: tpu7x:2x2x1
jax: 0.10.0
libtpu: 0.0.40
codegen_flags: <defaults>
</compile_context>

<pallas_src>
import math

import jax
import jax.numpy as jnp
import numpy as np
from jax.experimental import pallas as pl
from jax.experimental.pallas import tpu as pltpu

LANES = 384  # lcm(3, 128): per-channel pattern repeats exactly every 384 lanes


def bridge_kernel(w_ref, x_ref, o_ref):
    # w_ref: (1, 384) tiled per-channel scales (constant block, resident in VMEM)
    # x_ref / o_ref: (TM, 384) lane-dense row tile.
    # Single VPU broadcast-multiply; no MXU, no iota/select, unmasked full-vreg stores.
    o_ref[...] = x_ref[...] * w_ref[...]


def node_bridge_forward(x, w, *, block_rows=2048):
    """x: (..., 3); w: (3,) -- the three 1x1 Linear weights. Returns x * w per channel."""
    orig_shape = x.shape
    assert orig_shape[-1] == 3, "node_bridgeNoS expects last dim == 3"

    n_rows = math.prod(orig_shape[:-1]) if len(orig_shape) > 1 else 1
    total = n_rows * 3

    # Flatten the contiguous buffer; no transpose, no relayout.
    xf = x.reshape(-1)

    # Pad only the tail (< 384 elements) when total isn't a multiple of 384.
    pad = (-total) % LANES
    if pad:
        xf = jnp.pad(xf, (0, pad))
    m = xf.shape[0] // LANES
    x2d = xf.reshape(m, LANES)

    # Precomputed weight row: channel pattern tiled across 384 lanes.
    w_row = jnp.tile(w.astype(x.dtype), LANES // 3).reshape(1, LANES)

    # Row-block size: multiple of 8 (sublane rule) unless the whole array fits
    # in one block (full-dim blocks are always legal).  2048 rows = 3 MiB f32.
    if m <= block_rows:
        tm = m
    else:
        tm = max(8, (block_rows // 8) * 8)
    grid = pl.cdiv(m, tm)  # partial last block handled by boundary masking

    out = pl.pallas_call(
        bridge_kernel,
        out_shape=jax.ShapeDtypeStruct((m, LANES), x.dtype),
        grid=(grid,),
        in_specs=[
            pl.BlockSpec((1, LANES), lambda i: (0, 0)),   # weights: constant block
            pl.BlockSpec((tm, LANES), lambda i: (i, 0)),  # x: tiled along rows
        ],
        out_specs=pl.BlockSpec((tm, LANES), lambda i: (i, 0)),
        compiler_params=pltpu.CompilerParams(
            # Batch-row tiles are independent -> shard across TCs on v7x megacore.
            dimension_semantics=("parallel",),
        ),
    )(w_row, x2d)

    out_flat = out.reshape(-1)
    if pad:
        out_flat = out_flat[:total]
    return out_flat.reshape(orig_shape)


def ref_forward(x, w):
    # torch: cat(Linear_c(x_c) for c in 0..2) with Linear(1,1,bias=False) == x * w[c]
    return x * w


if __name__ == "__main__":
    key = jax.random.PRNGKey(0)
    kx, kw, kx2, kx3 = jax.random.split(key, 4)

    # Small shapes consistent with the module: x = (..., 3)
    x = jax.random.uniform(kx, (2, 8, 3), jnp.float32, minval=-1.0, maxval=1.0)
    w = jax.random.uniform(kw, (3,), jnp.float32, minval=-1.0, maxval=1.0)

    out = jax.block_until_ready(node_bridge_forward(x, w))
    ref = ref_forward(x, w)
    assert out.shape == x.shape
    np.testing.assert_allclose(np.asarray(out), np.asarray(ref), rtol=1e-6, atol=1e-6)

    # Exercise the tail-padding path (total not a multiple of 384).
    x2 = jax.random.uniform(kx2, (300, 3), jnp.float32, minval=-1.0, maxval=1.0)
    out2 = jax.block_until_ready(node_bridge_forward(x2, w))
    np.testing.assert_allclose(np.asarray(out2), np.asarray(ref_forward(x2, w)),
                               rtol=1e-6, atol=1e-6)

    # Exercise the multi-block grid path with a partial final block
    # (m = 21 rows of 384, tm = 8 -> grid = 3, last block covers 5 rows).
    x3 = jax.random.uniform(kx3, (2565, 3), jnp.float32, minval=-1.0, maxval=1.0)
    out3 = jax.block_until_ready(node_bridge_forward(x3, w, block_rows=8))
    np.testing.assert_allclose(np.asarray(out3), np.asarray(ref_forward(x3, w)),
                               rtol=1e-6, atol=1e-6)

    print("KERNEL_OK")
</pallas_src>

<mosaic_0001>
module attributes {stable_mosaic.version = 11 : i64} {
  func.func @bridge_kernel(%arg0: i32, %arg1: memref<1x384xf32, #tpu.memory_space<vmem>>, %arg2: memref<1x384xf32, #tpu.memory_space<vmem>>, %arg3: memref<1x384xf32, #tpu.memory_space<vmem>>) attributes {dimension_semantics = [#tpu.dimension_semantics<parallel>], iteration_bounds = array<i64: 1>, scalar_prefetch = 0 : i64, scratch_operands = 0 : i64, tpu.core_type = #tpu.core_type<tc>, window_params = [{pipeline_mode = #tpu.pipeline_mode<synchronous>, transform_indices = @transform_0, window_bounds = array<i64: 1, 384>}, {transform_indices = @transform_1, window_bounds = array<i64: 1, 384>}, {transform_indices = @transform_2, window_bounds = array<i64: 1, 384>}]} {
    %c0 = arith.constant 0 : index
    %c0_0 = arith.constant 0 : index
    %0 = vector.load %arg2[%c0, %c0_0] : memref<1x384xf32, #tpu.memory_space<vmem>>, vector<1x384xf32>
    %c0_1 = arith.constant 0 : index
    %c0_2 = arith.constant 0 : index
    %1 = vector.load %arg1[%c0_1, %c0_2] : memref<1x384xf32, #tpu.memory_space<vmem>>, vector<1x384xf32>
    %2 = arith.mulf %0, %1 : vector<1x384xf32>
    %c0_3 = arith.constant 0 : index
    %c0_4 = arith.constant 0 : index
    %3 = vector.load %arg3[%c0_3, %c0_4] : memref<1x384xf32, #tpu.memory_space<vmem>>, vector<1x384xf32>
    tpu.vector_store %arg3[%c0_3, %c0_4], %2 {strides = array<i32>} : memref<1x384xf32, #tpu.memory_space<vmem>>, vector<1x384xf32>,
    return
  }
  func.func @transform_0(%arg0: i32) -> (i32, i32) {
    %c0_i32 = arith.constant 0 : i32
    %c0_i32_0 = arith.constant 0 : i32
    %c0_i32_1 = arith.constant 0 : i32
    return %c0_i32, %c0_i32_0 : i32, i32
  }
  func.func @transform_1(%arg0: i32) -> (i32, i32) {
    %c0_i32 = arith.constant 0 : i32
    %c0_i32_0 = arith.constant 0 : i32
    return %arg0, %c0_i32 : i32, i32
  }
  func.func @transform_2(%arg0: i32) -> (i32, i32) {
    %c0_i32 = arith.constant 0 : i32
    %c0_i32_0 = arith.constant 0 : i32
    return %arg0, %c0_i32 : i32, i32
  }
}

</mosaic_0001>

<bundles_post_ra>
// kernel: tpu_custom_call.1
= control target key start
LH: loop header
LB: loop body
LE: loop exit
PB: predicated region body
PF: predicated region fallthrough
CT: control target
= control target key end

     0   :  { %7 = vsyncpa [#allocation3], 0  ;;  %s141_s0 = inlined_call_operand.hbm [shape: f32[1,384], index: 0, kind: input, shape index: {}]   ;;  %s142_s1 = inlined_call_operand.vmem [shape: f32[1,384], index: 1, kind: input, shape index: {}]   ;;  %s143_s2 = inlined_call_operand.hbm [shape: f32[1,384], index: 2, kind: output, shape index: {}]  }
   0x1   :  { %8 = vsyncpa [#allocation4], 0  ;;  %s97_s9 = smov [#allocation2]   ;;  %s49_s13 = scalar_lea.hbm %s141_s0, 48 }
   0x2   :  { %s15_s10 = sshll.u32 %s97_s9, 4  ;;  %p50_p0 = scmp.ne.s32.totalorder %s141_s0, %s49_s13  ;;  %s16_s10 = int_to_ptr.vmem [resolvable:$true] %s15_s10 }
   0x3   :  { %p53_p1 = scmp.lt.u32.totalorder %s49_s13, %s141_s0 }
   0x5   :  { %p55_p2 = pnand %p53_p1, %p50_p0 }
   0x7   :  { %58 = shalt.err (!%p55_p2)
}
   0x8   :  { %s59_s18 = scalar_lea.vmem %s16_s10, 48  ;;  %s63_s19 = scalar_lea.vmem %s16_s10, 64 }
   0x9   :  { %p60_p3 = scmp.ne.s32.totalorder %s16_s10, %s59_s18  ;;  %p64_p4 = scmp.lt.s32.totalorder %s16_s10, %s16_s10 }
   0xa   :  { %p65_p5 = scmp.lt.s32.totalorder %s63_s19, %s59_s18 }
   0xc   :  { %p66_p6 = por %p65_p5, %p64_p4 }
   0xe   :  { %p67_p7 = pnand %p66_p6, %p60_p3 }
  0x10   :  { %70 = shalt.err (!%p67_p7)
}
  0x11   :  { %18 = dma.hbm_to_vmem [thread:$0]  %s141_s0, 48, %s16_s10, [#allocation3]  }
  0x12   :  { %93 = dma.done.wait [#allocation3], 48  }
  0x13   :  { %94 = vsyncadd [#allocation3], 4294967248  ;;  %v27_v0 = vlaneseq  ;;  %s98_s22 = smov [#allocation5]   ;;  %v24_v1 = vld [vmem:[%s142_s1] sm:$0x7] }
  0x14   :  { %s38_s23 = sshll.u32 %s98_s22, 4  ;;  %v25_v2 = vld [vmem:[#allocation2] sm:$0x7]  ;;  %s39_s23 = int_to_ptr.vmem [resolvable:$true] %s38_s23 }
  0x15   :  { %vm29_vm0 = vcmp.lt.s32.totalorder %v27_v0, 384  ;;  %v26_v3 = vmul.f32 %v25_v2, %v24_v1  ;;  %s71_s26 = scalar_lea.vmem %s39_s23, 48  ;;  %s75_s27 = scalar_lea.vmem %s39_s23, 64 }
  0x16   :  { %p72_p8 = scmp.ne.s32.totalorder %s39_s23, %s71_s26  ;;  %p76_p9 = scmp.lt.s32.totalorder %s39_s23, %s39_s23 }
  0x17   :  { %31 = vst.msk [vmem:[#allocation5] sm:$0x7] %vm29_vm0, %v26_v3  ;;  %p77_p10 = scmp.lt.s32.totalorder %s75_s27, %s71_s26 }
  0x19   :  { %p78_p11 = por %p77_p10, %p76_p9 }
  0x1b   :  { %p79_p12 = pnand %p78_p11, %p72_p8 }
  0x1d   :  { %82 = shalt.err (!%p79_p12)
}
  0x1e   :  { %s83_s29 = scalar_lea.hbm %s143_s2, 48 }
  0x1f   :  { %p84_p13 = scmp.ne.s32.totalorder %s143_s2, %s83_s29  ;;  %p87_p0 = scmp.lt.u32.totalorder %s83_s29, %s143_s2 }
  0x21   :  { %p89_p1 = pnand %p87_p0, %p84_p13 }
  0x23   :  { %92 = shalt.err (!%p89_p1)
}
  0x24   :  { %41 = dma.vmem_to_hbm [thread:$0]  %s39_s23, 48, %s143_s2, [#allocation4]  }
  0x25   :  { %95 = dma.done.wait [#allocation4], 48  }
  0x26   :  { %96 = vsyncadd [#allocation4], 4294967248 }
  0x27   :  { %45 = vsyncpa [#allocation3], 1 }
  0x28   :  { %46 = vsyncpa [#allocation4], 1 }

</bundles_post_ra>
